<compile_context>
chip_gen: v7x
topology: tpu7x:2x2x1
jax: 0.10.0
libtpu: 0.0.40
codegen_flags: <defaults>
</compile_context>

<pallas_src>
import functools
import math

import jax
import jax.numpy as jnp
from jax.experimental import pallas as pl
from jax.experimental.pallas import tpu as pltpu

BN_EPS = 1e-5


# ----------------------------------------------------------------------------
# helpers
# ----------------------------------------------------------------------------
def _rup(x, m):
    return ((x + m - 1) // m) * m


def _pick_tm(M):
    """Sublane (row) tile: multiple of 16 (bf16 packing), minimal padding."""
    if M <= 512:
        return _rup(M, 16)
    best_tm, best_mp = 512, _rup(M, 512)
    for cand in (448, 384, 320, 256, 192, 128):
        mp = _rup(M, cand)
        if mp < best_mp:
            best_tm, best_mp = cand, mp
    return best_tm


def _pick_tk(K):
    """Reduction tile.  Small K -> a single k step (no accumulator loop)."""
    kp = _rup(K, 128)
    if kp <= 1152:          # covers every 1x1 conv and the small 3x3 convs
        return kp, kp
    if kp % 576 == 0:       # 3x3 convs: K = 9 * C
        return 576, kp
    return 512, _rup(K, 512)


def _pick_tn(N):
    np_ = _rup(N, 128)
    return (128 if np_ <= 256 else 256), np_


# ----------------------------------------------------------------------------
# fused matmul kernel
#   out = [relu]( relu(x * si + bi) @ w * so + bo [+ residual] )
#   (each piece optional; bf16 MXU operands, f32 accumulate + epilogue)
# ----------------------------------------------------------------------------
def _make_mm_kernel(in_act, out_affine, out_relu, has_res):
    def kernel(*refs):
        it = iter(refs)
        x_ref = next(it)
        w_ref = next(it)
        si_ref = next(it) if in_act else None
        bi_ref = next(it) if in_act else None
        so_ref = next(it) if out_affine else None
        bo_ref = next(it) if out_affine else None
        r_ref = next(it) if has_res else None
        o_ref = next(it)
        acc_ref = next(it)

        @pl.when(pl.program_id(2) == 0)
        def _():
            acc_ref[...] = jnp.zeros_like(acc_ref)

        x = x_ref[...]
        if in_act:
            # pre-activation BN + ReLU on the conv input (ResNet v2)
            xf = x.astype(jnp.float32) * si_ref[...] + bi_ref[...]
            x = jnp.maximum(xf, 0.0).astype(jnp.bfloat16)
        acc_ref[...] += jnp.dot(x, w_ref[...],
                                preferred_element_type=jnp.float32)

        @pl.when(pl.program_id(2) == pl.num_programs(2) - 1)
        def _():
            y = acc_ref[...]
            if out_affine:
                y = y * so_ref[...] + bo_ref[...]
            if has_res:
                y = y + r_ref[...].astype(jnp.float32)
            if out_relu:
                y = jnp.maximum(y, 0.0)
            o_ref[...] = y.astype(o_ref.dtype)

    return kernel


def fused_matmul(x, w, *, in_scale=None, in_bias=None, out_scale=None,
                 out_bias=None, residual=None, out_relu=False,
                 out_dtype=jnp.bfloat16):
    """(M,K) @ (K,N) with optional fused pre-act / BN / ReLU / residual."""
    x = x.astype(jnp.bfloat16)
    w = w.astype(jnp.bfloat16)
    M, K = x.shape
    K2, Nc = w.shape
    assert K == K2

    in_act = in_scale is not None
    out_affine = out_scale is not None
    has_res = residual is not None

    tm = _pick_tm(M)
    tk, Kp = _pick_tk(K)
    tn, Np = _pick_tn(Nc)
    Mp = _rup(M, tm)

    xp = x if (Mp == M and Kp == K) else jnp.pad(x, ((0, Mp - M), (0, Kp - K)))
    wp = w if (Kp == K and Np == Nc) else jnp.pad(w, ((0, Kp - K), (0, Np - Nc)))

    args = [xp, wp]
    in_specs = [
        pl.BlockSpec((tm, tk), lambda i, j, k: (i, k)),
        pl.BlockSpec((tk, tn), lambda i, j, k: (k, j)),
    ]
    if in_act:
        sip = jnp.pad(in_scale.astype(jnp.float32), (0, Kp - K)).reshape(1, Kp)
        bip = jnp.pad(in_bias.astype(jnp.float32), (0, Kp - K)).reshape(1, Kp)
        args += [sip, bip]
        in_specs += [pl.BlockSpec((1, tk), lambda i, j, k: (0, k))] * 2
    if out_affine:
        sop = jnp.pad(out_scale.astype(jnp.float32), (0, Np - Nc)).reshape(1, Np)
        bop = jnp.pad(out_bias.astype(jnp.float32), (0, Np - Nc)).reshape(1, Np)
        args += [sop, bop]
        in_specs += [pl.BlockSpec((1, tn), lambda i, j, k: (0, j))] * 2
    if has_res:
        rp = residual.astype(jnp.bfloat16)
        if Mp != M or Np != Nc:
            rp = jnp.pad(rp, ((0, Mp - M), (0, Np - Nc)))
        args.append(rp)
        in_specs.append(pl.BlockSpec((tm, tn), lambda i, j, k: (i, j)))

    kernel = _make_mm_kernel(in_act, out_affine, out_relu, has_res)

    out = pl.pallas_call(
        kernel,
        out_shape=jax.ShapeDtypeStruct((Mp, Np), out_dtype),
        grid_spec=pltpu.PrefetchScalarGridSpec(
            num_scalar_prefetch=0,
            grid=(Mp // tm, Np // tn, Kp // tk),
            in_specs=in_specs,
            out_specs=pl.BlockSpec((tm, tn), lambda i, j, k: (i, j)),
            scratch_shapes=[pltpu.VMEM((tm, tn), jnp.float32)]),
        compiler_params=pltpu.CompilerParams(
            dimension_semantics=("parallel", "parallel", "arbitrary")),
    )(*args)
    return out[:M, :Nc]


# ----------------------------------------------------------------------------
# pooling kernels
# ----------------------------------------------------------------------------
def _maxpool_kernel(x_ref, o_ref):
    # x_ref: (k*k, tm, C) -> max over window axis
    o_ref[...] = jnp.max(x_ref[...], axis=0)


def maxpool2d(x, ksize=3, stride=2, pad=1):
    """NHWC max pool (PyTorch MaxPool2d(ksize, stride, pad) semantics)."""
    N, H, W, C = x.shape
    Ho = (H + 2 * pad - ksize) // stride + 1
    Wo = (W + 2 * pad - ksize) // stride + 1
    neg = jnp.finfo(x.dtype).min
    xp = jnp.pad(x, ((0, 0), (pad, pad), (pad, pad), (0, 0)),
                 constant_values=neg)
    cols = []
    for kh in range(ksize):
        for kw in range(ksize):
            cols.append(xp[:, kh:kh + (Ho - 1) * stride + 1:stride,
                           kw:kw + (Wo - 1) * stride + 1:stride, :])
    stacked = jnp.stack(cols, axis=0).reshape(ksize * ksize, N * Ho * Wo, C)

    M = N * Ho * Wo
    tm = _pick_tm(M)
    Mp = _rup(M, tm)
    if Mp != M:
        stacked = jnp.pad(stacked, ((0, 0), (0, Mp - M), (0, 0)),
                          constant_values=neg)

    out = pl.pallas_call(
        _maxpool_kernel,
        out_shape=jax.ShapeDtypeStruct((Mp, C), x.dtype),
        grid_spec=pltpu.PrefetchScalarGridSpec(
            num_scalar_prefetch=0,
            grid=(Mp // tm,),
            in_specs=[pl.BlockSpec((ksize * ksize, tm, C),
                                   lambda i: (0, i, 0))],
            out_specs=pl.BlockSpec((tm, C), lambda i: (i, 0))),
        compiler_params=pltpu.CompilerParams(
            dimension_semantics=("parallel",)),
    )(stacked)
    return out[:M].reshape(N, Ho, Wo, C)


def _bn_relu_avgpool_kernel(x_ref, s_ref, b_ref, o_ref):
    # x_ref: (N, H*W, C); fused final BN + ReLU + global average pool
    x = x_ref[...].astype(jnp.float32)
    y = jnp.maximum(x * s_ref[...] + b_ref[...], 0.0)
    o_ref[...] = jnp.mean(y, axis=1)


def bn_relu_global_avgpool(x, scale, bias):
    N, H, W, C = x.shape
    xr = x.reshape(N, H * W, C)
    s = scale.astype(jnp.float32).reshape(1, 1, C)
    b = bias.astype(jnp.float32).reshape(1, 1, C)
    return pl.pallas_call(
        _bn_relu_avgpool_kernel,
        out_shape=jax.ShapeDtypeStruct((N, C), jnp.float32),
        grid_spec=pltpu.PrefetchScalarGridSpec(
            num_scalar_prefetch=0,
            grid=(1,),
            in_specs=[pl.BlockSpec((N, H * W, C), lambda i: (0, 0, 0)),
                      pl.BlockSpec((1, 1, C), lambda i: (0, 0, 0)),
                      pl.BlockSpec((1, 1, C), lambda i: (0, 0, 0))],
            out_specs=pl.BlockSpec((N, C), lambda i: (0, 0))),
    )(xr, s, b)


# ----------------------------------------------------------------------------
# plain-JAX glue: im2col, BN folding, parameter init
# ----------------------------------------------------------------------------
def _im2col(x, ksize, stride, pad):
    """NHWC -> (N*Ho*Wo, ksize*ksize*C), patch flattened in (kh, kw, c) order."""
    N, H, W, C = x.shape
    Ho = (H + 2 * pad - ksize) // stride + 1
    Wo = (W + 2 * pad - ksize) // stride + 1
    xp = jnp.pad(x, ((0, 0), (pad, pad), (pad, pad), (0, 0)))
    cols = []
    for kh in range(ksize):
        for kw in range(ksize):
            cols.append(xp[:, kh:kh + (Ho - 1) * stride + 1:stride,
                           kw:kw + (Wo - 1) * stride + 1:stride, :])
    patches = jnp.stack(cols, axis=3)                 # (N, Ho, Wo, k*k, C)
    return patches.reshape(N * Ho * Wo, ksize * ksize * C), Ho, Wo


def _bn_fold(c):
    # inference-mode BN with identity statistics folded to scale/bias
    gamma = jnp.ones((c,), jnp.float32)
    beta = jnp.zeros((c,), jnp.float32)
    mean = jnp.zeros((c,), jnp.float32)
    var = jnp.ones((c,), jnp.float32)
    scale = gamma / jnp.sqrt(var + BN_EPS)
    bias = beta - mean * scale
    return scale, bias


def _conv_w(key, k, cin, cout):
    # kaiming_normal_(mode='fan_out', nonlinearity='relu'); generated directly
    # in (k*k*cin, cout) matmul layout and pre-cast to bf16 (MXU operand).
    std = math.sqrt(2.0 / (cout * k * k))
    w = jax.random.normal(key, (k * k * cin, cout), jnp.float32) * std
    return w.astype(jnp.bfloat16)


def _make_block(key, in_places, places, stride, downsampling, expansion):
    k1, k2, k3, k4 = jax.random.split(key, 4)
    blk = {"stride": stride, "downsampling": downsampling,
           "places": places, "expansion": expansion}
    blk["s1"], blk["b1"] = _bn_fold(in_places)     # BN1 (pre-act on block input)
    blk["w1"] = _conv_w(k1, 1, in_places, places)
    blk["s2"], blk["b2"] = _bn_fold(places)        # BN2 (fused in conv1 epilogue)
    blk["w2"] = _conv_w(k2, 3, places, places)
    blk["s3"], blk["b3"] = _bn_fold(places)        # BN3 (fused in conv2 epilogue)
    blk["w3"] = _conv_w(k3, 1, places, places * expansion)
    if downsampling:
        blk["wd"] = _conv_w(k4, 1, in_places, places * expansion)  # no BN
    return blk


def build_params(key, blocks, num_classes=1000, expansion=4):
    keys = jax.random.split(key, 3 + len(blocks))
    p = {}
    p["conv1_w"] = _conv_w(keys[0], 7, 3, 64)      # stem: conv only (no BN/ReLU)

    cfg = [(64, 64, 1), (256, 128, 2), (512, 256, 2), (1024, 512, 2)]
    layers = []
    for li, nb in enumerate(blocks):
        in_places, places, stride = cfg[li]
        bkeys = jax.random.split(keys[1 + li], nb)
        layer = [_make_block(bkeys[0], in_places, places, stride, True,
                             expansion)]
        for bi in range(1, nb):
            layer.append(_make_block(bkeys[bi], places * expansion, places, 1,
                                     False, expansion))
        layers.append(layer)
    p["layers"] = layers

    feat = 512 * expansion
    p["bnf_s"], p["bnf_b"] = _bn_fold(feat)        # final BatchNorm2d(2048)

    kfw, kfb = jax.random.split(keys[1 + len(blocks)])
    bound = 1.0 / math.sqrt(feat)
    p["fc_w"] = jax.random.uniform(kfw, (feat, num_classes), jnp.float32,
                                   -bound, bound)
    p["fc_b"] = jax.random.uniform(kfb, (num_classes,), jnp.float32,
                                   -bound, bound)
    return p


# ----------------------------------------------------------------------------
# forward pass (pre-activation bottleneck, ResNet v2)
# ----------------------------------------------------------------------------
def bottleneck_forward(x, blk):
    N, H, W, Cin = x.shape
    places = blk["places"]
    stride = blk["stride"]
    expansion = blk["expansion"]

    # conv1 (1x1): relu(bn1(x)) fused on input, bn2+relu fused on output
    z1 = fused_matmul(x.reshape(N * H * W, Cin), blk["w1"],
                      in_scale=blk["s1"], in_bias=blk["b1"],
                      out_scale=blk["s2"], out_bias=blk["b2"],
                      out_relu=True).reshape(N, H, W, places)

    # conv2 (3x3, stride): im2col glue, bn3+relu fused on output
    patches, Ho, Wo = _im2col(z1, 3, stride, 1)
    z2 = fused_matmul(patches, blk["w2"],
                      out_scale=blk["s3"], out_bias=blk["b3"],
                      out_relu=True).reshape(N, Ho, Wo, places)

    # residual branch operates on the raw (un-preactivated) input x
    if blk["downsampling"]:
        xs = x[:, ::stride, ::stride, :].reshape(N * Ho * Wo, Cin)
        res = fused_matmul(xs, blk["wd"])          # plain 1x1 conv, no BN/ReLU
    else:
        res = x.reshape(N * Ho * Wo, Cin)

    # conv3 (1x1, expand) + residual add; no activation (next block pre-acts)
    out = fused_matmul(z2.reshape(N * Ho * Wo, places), blk["w3"],
                       residual=res)
    return out.reshape(N, Ho, Wo, places * expansion)


def resnetv2_forward(x_nchw, p):
    # NCHW (PyTorch) -> NHWC bf16 for the TPU kernels
    x = jnp.transpose(x_nchw, (0, 2, 3, 1)).astype(jnp.bfloat16)
    N = x.shape[0]

    # stem (Conv1v2): 7x7/2 conv (no BN/ReLU), then 3x3/2 maxpool
    patches, Ho, Wo = _im2col(x, 7, 2, 3)
    y = fused_matmul(patches, p["conv1_w"]).reshape(N, Ho, Wo, 64)
    y = maxpool2d(y, 3, 2, 1)

    for layer in p["layers"]:
        for blk in layer:
            y = bottleneck_forward(y, blk)

    # final BN + ReLU + AvgPool2d(7): spatial is exactly 7x7 here
    assert y.shape[1] == 7 and y.shape[2] == 7, y.shape
    feat = bn_relu_global_avgpool(y, p["bnf_s"], p["bnf_b"])   # (N, 2048) f32

    # tiny FC (batch x 2048 @ 2048 x classes): plain jnp per perf review
    return feat @ p["fc_w"] + p["fc_b"]


# ----------------------------------------------------------------------------
if __name__ == "__main__":
    # Minimal-depth ResNetv2.  AvgPool2d(7) + Linear(2048) hard-code a
    # 224x224 input (the smallest spatial size the module's dims chain for).
    blocks = [1, 1, 1, 1]
    num_classes = 10

    key = jax.random.PRNGKey(0)
    pkey, xkey = jax.random.split(key)
    params = build_params(pkey, blocks, num_classes=num_classes)

    x = jax.random.normal(xkey, (1, 3, 224, 224), jnp.float32)

    logits = resnetv2_forward(x, params)
    logits = jax.block_until_ready(logits)

    assert logits.shape == (1, num_classes), logits.shape
    assert bool(jnp.all(jnp.isfinite(logits)))
    print("KERNEL_OK")
</pallas_src>

<mosaic_0001>
module attributes {stable_mosaic.version = 11 : i64} {
  func.func @kernel(%arg0: i32, %arg1: i32, %arg2: i32, %arg3: memref<448x256xbf16, #tpu.memory_space<vmem>>, %arg4: memref<256x128xbf16, #tpu.memory_space<vmem>>, %arg5: memref<448x128xbf16, #tpu.memory_space<vmem>>, %arg6: memref<448x128xf32, #tpu.memory_space<vmem>>) attributes {dimension_semantics = [#tpu.dimension_semantics<parallel>, #tpu.dimension_semantics<parallel>, #tpu.dimension_semantics<arbitrary>], iteration_bounds = array<i64: 28, 1, 1>, scalar_prefetch = 0 : i64, scratch_operands = 1 : i64, tpu.core_type = #tpu.core_type<tc>, window_params = [{transform_indices = @transform_0, window_bounds = array<i64: 448, 256>}, {transform_indices = @transform_1, window_bounds = array<i64: 256, 128>}, {transform_indices = @transform_2, window_bounds = array<i64: 448, 128>}]} {
    %c0_i32 = arith.constant 0 : i32
    %0 = arith.cmpi eq, %arg2, %c0_i32 : i32
    %1 = arith.extui %0 : i1 to i32
    %c0_i32_0 = arith.constant 0 : i32
    %2 = arith.cmpi ne, %1, %c0_i32_0 : i32
    scf.if %2 {
      %cst_10 = arith.constant 0.000000e+00 : f32
      %12 = vector.broadcast %cst_10 : f32 to vector<448x128xf32>
      %c0_11 = arith.constant 0 : index
      %c0_12 = arith.constant 0 : index
      %13 = vector.load %arg6[%c0_11, %c0_12] : memref<448x128xf32, #tpu.memory_space<vmem>>, vector<448x128xf32>
      tpu.vector_store %arg6[%c0_11, %c0_12], %12 {strides = array<i32>} : memref<448x128xf32, #tpu.memory_space<vmem>>, vector<448x128xf32>,
    } else {
    }
    %c0 = arith.constant 0 : index
    %c0_1 = arith.constant 0 : index
    %3 = vector.load %arg3[%c0, %c0_1] : memref<448x256xbf16, #tpu.memory_space<vmem>>, vector<448x256xbf16>
    %c0_2 = arith.constant 0 : index
    %c0_3 = arith.constant 0 : index
    %4 = vector.load %arg6[%c0_2, %c0_3] : memref<448x128xf32, #tpu.memory_space<vmem>>, vector<448x128xf32>
    %c0_4 = arith.constant 0 : index
    %c0_5 = arith.constant 0 : index
    %5 = vector.load %arg4[%c0_4, %c0_5] : memref<256x128xbf16, #tpu.memory_space<vmem>>, vector<256x128xbf16>
    %cst = arith.constant dense<0.000000e+00> : vector<448x128xf32>
    %6 = tpu.matmul %3, %5, %cst {dimension_numbers = #tpu.dot_dimension_numbers<[1], [0], [0], [1], [0, 0, 1, 1], [], []>} : vector<448x256xbf16>, vector<256x128xbf16>, vector<448x128xf32> -> vector<448x128xf32>
    %7 = arith.addf %4, %6 : vector<448x128xf32>
    %c0_6 = arith.constant 0 : index
    %c0_7 = arith.constant 0 : index
    %8 = vector.load %arg6[%c0_6, %c0_7] : memref<448x128xf32, #tpu.memory_space<vmem>>, vector<448x128xf32>
    tpu.vector_store %arg6[%c0_6, %c0_7], %7 {strides = array<i32>} : memref<448x128xf32, #tpu.memory_space<vmem>>, vector<448x128xf32>,
    %c0_i32_8 = arith.constant 0 : i32
    %9 = arith.cmpi eq, %arg2, %c0_i32_8 : i32
    %10 = arith.extui %9 : i1 to i32
    %c0_i32_9 = arith.constant 0 : i32
    %11 = arith.cmpi ne, %10, %c0_i32_9 : i32
    scf.if %11 {
      %c0_10 = arith.constant 0 : index
      %c0_11 = arith.constant 0 : index
      %12 = vector.load %arg6[%c0_10, %c0_11] : memref<448x128xf32, #tpu.memory_space<vmem>>, vector<448x128xf32>
      %13 = arith.truncf %12 : vector<448x128xf32> to vector<448x128xbf16>
      %c0_12 = arith.constant 0 : index
      %c0_13 = arith.constant 0 : index
      %14 = vector.load %arg5[%c0_12, %c0_13] : memref<448x128xbf16, #tpu.memory_space<vmem>>, vector<448x128xbf16>
      tpu.vector_store %arg5[%c0_12, %c0_13], %13 {strides = array<i32>} : memref<448x128xbf16, #tpu.memory_space<vmem>>, vector<448x128xbf16>,
    } else {
    }
    return
  }
  func.func @transform_0(%arg0: i32, %arg1: i32, %arg2: i32) -> (i32, i32) {
    %c0_i32 = arith.constant 0 : i32
    return %arg0, %arg2 : i32, i32
  }
  func.func @transform_1(%arg0: i32, %arg1: i32, %arg2: i32) -> (i32, i32) {
    %c0_i32 = arith.constant 0 : i32
    return %arg2, %arg1 : i32, i32
  }
  func.func @transform_2(%arg0: i32, %arg1: i32, %arg2: i32) -> (i32, i32) {
    %c0_i32 = arith.constant 0 : i32
    return %arg0, %arg1 : i32, i32
  }
}

</mosaic_0001>

<bundles_post_ra>
// kernel: tpu_custom_call.1
= control target key start
LH: loop header
LB: loop body
LE: loop exit
PB: predicated region body
PF: predicated region fallthrough
CT: control target
= control target key end

     0   :  { %7 = vsyncpa [#allocation4], 0  ;;  %s2711_s0 = inlined_call_operand.hbm [shape: bf16[12544,256], index: 0, kind: input, shape index: {}]   ;;  %s2712_s1 = inlined_call_operand.hbm [shape: bf16[256,128], index: 1, kind: input, shape index: {}]   ;;  %s2713_s2 = inlined_call_operand.hbm [shape: bf16[12544,128], index: 2, kind: output, shape index: {}]  }
   0x1   :  { %9 = vsyncpa [#allocation4 + $0x1], 0 }
   0x2   :  { %10 = vsyncpa [#allocation7], 0 }
   0x3   :  { %11 = vsyncpa [#allocation5], 0 }
   0x4   :  { %13 = vsyncpa [#allocation5 + $0x1], 0  ;;  %s2378_s9 = smov 0   ;;  %s2380_s10 = smov 0  }
   0x5   :  { %s2382_s11 = smov 0   ;;  %s2384_s12 = smov 0  }
   0x6   :  { %s2386_s13 = smov 0   ;;  %s2388_s14 = smov 0  }
   0x7 LB: > { %s1625_s15 = sadd.s32 4294967295, %s2351_s14   ;;  %s1626_s16 = sadd.s32 4294967294, %s2351_s14   ;;  %s2351_s14 = sphi %s2388_s14, %s19_s14   ;;  %s2347_s13 = sphi %s2386_s13, %s2735_s13   ;;  %s2343_s12 = sphi %s2384_s12, %s2734_s12   ;;  %s2339_s11 = sphi %s2382_s11, %s2733_s11   ;;  %s2335_s10 = sphi %s2380_s10, %s2732_s10   ;;  %s2331_s9 = sphi %s2378_s9, %s2731_s9  }
   0x8   : > { %p60_p0 = scmp.ne.s32.totalorder %s2335_s10, %s2331_s9  ;;  %p2412_p1 = scmp.eq.s32.totalorder %s1625_s15, 0 }
   0x9   : > { %p2416_p2 = scmp.eq.s32.totalorder %s1625_s15, 27  ;;  %p120_p3 = scmp.eq.s32.totalorder %s1626_s16, 27 }
   0xa   : > { %s2718_s17 = scalar_select %p2412_p1, 1, 0 }
   0xb   : > { %s2719_s18 = scalar_select %p2416_p2, 1, 0 }
   0xc   : > { %p2422_p4 = por %p2412_p1, %p60_p0  ;;  %p1627_p5 = scmp.ge.s32.totalorder %s2351_s14, 1 }
   0xd   : > { %p2427_p6 = por %p120_p3, %p60_p0  ;;  %p127_p7 = scmp.lt.s32.totalorder %s2351_s14, 29 }
   0xe   : > { %s2720_s19 = scalar_select %p2422_p4, 1, 0 }
   0xf   : > { %s2721_s20 = scalar_select %p2427_p6, 1, 0 }
  0x10   : > { %p2432_p8 = pnand %p1627_p5, %p127_p7  ;;  %s2353_s22 = smov [#allocation6]  }
  0x11   : > { %s143_s23 = sshll.u32 %s2353_s22, 4  ;;  %s38_s25 = sadd.s32 1, %s2347_s13  ;;  %s144_s23 = int_to_ptr.vmem [resolvable:$true] %s143_s23 }
  0x12   : > { %s2722_s21 = scalar_select %p2432_p8, 1, 0 }
  0x13   : > { %p2035_p9 = pneg %p2432_p8  ;;  %s2207_s28 = scalar_lea.hbm %s2712_s1, 2048 }
  0x14   : > { %p2208_p11 = scmp.ne.s32.totalorder %s2712_s1, %s2207_s28  ;;  %p2214_p3 = scmp.lt.u32.totalorder %s2207_s28, %s2712_s1 }
  0x15   : > { %p2440_p10 = pnand %p2035_p9, %p2412_p1 }
  0x17   : > { %p2209_p12 = pneg %p2440_p10 }
  0x19   : > { %p2210_p13 = pnand %p2209_p12, %p2208_p11 }
  0x1b   : > { %p2211_p0 = pneg %p2210_p13 }
  0x1d   : > { %p2216_p5 = pnand %p2214_p3, %p2211_p0 }
  0x1f   : > { %2219 = shalt.err (!%p2216_p5)
}
  0x20   : > { %s2220_s5 = scalar_lea.vmem %s144_s23, 2048  ;;  %p2228_p1 = scmp.lt.s32.totalorder %s144_s23, %s144_s23 }
  0x21   : > { %p2221_p7 = scmp.ne.s32.totalorder %s144_s23, %s2220_s5  ;;  %p2229_p4 = scmp.lt.s32.totalorder %s2220_s5, %s2220_s5 }
  0x23   : > { %p2223_p9 = pnand %p2221_p7, %p2209_p12  ;;  %p2230_p8 = por %p2229_p4, %p2228_p1 }
  0x25   : > { %p2224_p6 = pneg %p2223_p9 }
  0x27   : > { %p2231_p2 = pnand %p2230_p8, %p2224_p6 }
  0x29   : > { %2234 = shalt.err (!%p2231_p2)
}
  0x2a   : > { %s2354_s6 = smov 64   ;;  %s2355_s7 = smov 4  }
  0x2b   : > { %2038 = dma.hbm_to_vmem [thread:$0]  (!%p2440_p10), %s2712_s1, 2048, %s144_s23, [#allocation7], %s2354_s6, %s2354_s6, %s2355_s7  }
  0x2c   : > { %p40_p1 = scmp.ge.s32.totalorder %s38_s25, 28  ;;  %s47_s16 = sadd.s32 1, %s2339_s11 }
  0x2d   : > { %p54_p2 = scmp.ne.s32.totalorder %s2339_s11, %s2335_s10  ;;  %p55_p4 = scmp.eq.s32.totalorder %s2351_s14, 0 }
  0x2e   : > { %s2737_s25 = smov (%p40_p1, %s38_s25), 0  ;;  %p2724_p8 = scmp.ne.s32.totalorder %s2719_s18, 0 }
  0x2f   : > { %p56_p6 = por %p55_p4, %p54_p2  ;;  %s42_s26 = ssub.s32 %s2347_s13, %s2737_s25 }
  0x30   : > { %p2469_p11 = por %p2724_p8, %p54_p2  ;;  %p2048_p12 = scmp.lt.s32.totalorder %s2351_s14, 28 }
  0x31   : > { %p45_p13 = scmp.eq.s32.totalorder %s42_s26, 0  ;;  %s157_s24 = sand.u32 1, %s2339_s11  }
  0x32   : > { %s2024_s27 = smul.u32 448, %s157_s24  ;;  %p2481_p10 = pnand %p2048_p12, %p56_p6 }
  0x33   : > { %s2478_s28 = scalar_select %p45_p13, %s2339_s11, %s47_s16  }
  0x34   : > { %s1964_s23 = smul.u32 7168, %s2347_s13  ;;  %s161_s29 = scalar_lea.vmem [#allocation3], %s2024_s27 }
  0x35   : > { %s171_s30 = sshll.u32 %s161_s29, 4  ;;  %s2492_s6 = scalar_lea.sflag [#allocation4], %s157_s24  ;;  %s2490_s30 = int_to_ptr.vmem [resolvable:$true] %s171_s30 }
  0x36   : > { %s2488_s5 = scalar_lea.hbm %s2711_s0, %s1964_s23  ;;  %p2237_p3 = pneg %p2481_p10 }
  0x37   : > { %s2235_s7 = scalar_lea.hbm %s2488_s5, 7168  ;;  %s2240_s16 = scalar_lea.hbm %s2711_s0, 200704 }
  0x38   : > { %p2236_p0 = scmp.ne.s32.totalorder %s2488_s5, %s2235_s7  ;;  %p2241_p9 = scmp.lt.u32.totalorder %s2488_s5, %s2711_s0 }
  0x39   : > { %p2242_p1 = scmp.lt.u32.totalorder %s2240_s16, %s2235_s7  ;;  %p2244_p4 = scmp.lt.u32.totalorder %s2235_s7, %s2488_s5 }
  0x3a   : > { %p2238_p5 = pnand %p2237_p3, %p2236_p0 }
  0x3b   : > { %p2243_p2 = por %p2242_p1, %p2241_p9 }
  0x3c   : > { %p2239_p7 = pneg %p2238_p5 }
  0x3d   : > { %p2245_p6 = por %p2244_p4, %p2243_p2 }
  0x3f   : > { %p2246_p8 = pnand %p2245_p6, %p2239_p7 }
  0x41   : > { %2249 = shalt.err (!%p2246_p8)
}
  0x42   : > { %s2250_s24 = scalar_lea.vmem %s2490_s30, 7168  ;;  %s2356_s23 = smov [#allocation3]  }
  0x43   : > { %p2251_p12 = scmp.ne.s32.totalorder %s2490_s30, %s2250_s24  ;;  %s2255_s29 = sshll.u32 %s2356_s23, 4  ;;  %s2256_s29 = int_to_ptr.vmem [resolvable:$false] %s2255_s29 }
  0x44   : > { %s2257_s4 = scalar_lea.vmem %s2256_s29, 14336  ;;  %p2258_p5 = scmp.lt.s32.totalorder %s2490_s30, %s2256_s29 }
  0x45   : > { %p2253_p13 = pnand %p2251_p12, %p2237_p3  ;;  %p2259_p9 = scmp.lt.s32.totalorder %s2257_s4, %s2250_s24 }
  0x47   : > { %p2254_p0 = pneg %p2253_p13  ;;  %p2260_p1 = por %p2259_p9, %p2258_p5 }
  0x49   : > { %p2261_p2 = pnand %p2260_p1, %p2254_p0 }
  0x4b   : > { %2264 = shalt.err (!%p2261_p2)
}
  0x4c   : > { %s2357_s18 = smov 128   ;;  %s2358_s7 = smov 8  }
  0x4d   : > { %2042 = dma.hbm_to_vmem [thread:$0]  (!%p2481_p10), %s2488_s5, 7168, %s2490_s30, %s2492_s6, %s2357_s18, %s2357_s18, %s2358_s7  }
  0x4e   : > { %p2727_p3 = scmp.ne.s32.totalorder %s2722_s21, 0 }
  0x4f   : > { %s2523_s8 = sand.u32 (!%p2727_p3), 1, %s2335_s10   ;;  %p2728_p7 = scmp.ne.s32.totalorder (!%p2727_p3), %s2720_s19, 0 }
  0x50   : > { %183 = sbr.rel (%p2727_p3) target bundleno = 491 (0x1eb), region = 28  ;;  %s186_s16 = scalar_lea.sflag (!%p2727_p3), [#allocation4], %s2523_s8 }
  0x51   : > { %s2025_s15 = smul.u32 (!%p2727_p3), 448, %s2523_s8 }
  0x53   : > { %s2527_s26 = scalar_lea.vmem (!%p2727_p3), [#allocation3], %s2025_s15 }
  0x57   : > { %2318 = dma.done.wait (%p2728_p7), %s186_s16, 7168  }
  0x58   : > { %2320 = vsyncadd (%p2728_p7), %s186_s16, 4294960128  ;;  %p2729_p10 = scmp.ne.s32.totalorder %s2718_s17, 0 }
  0x5a   : > { %2322 = dma.done.wait (%p2729_p10), [#allocation7], 2048  }
  0x5b   : > { %2324 = vsyncadd (%p2729_p10), [#allocation7], 4294965248  ;;  %v2359_v0 = vmov 0   ;;  %v2107_v1 = vld [vmem:[#allocation6] sm:$0xff]   ;;  %v2108_v2 = vld [vmem:[#allocation6 + $0x8] sm:$0xff]   ;;  %s2026_s17 = smul.u32 224, %s2523_s8 }
  0x5c   : > { %799 = vmatprep.subr.bf16.mxu0 %v2359_v0  ;;  %1992 = vmatprep.subr.bf16.mxu1 %v2359_v0  ;;  %v2109_v3 = vld [vmem:[#allocation6 + $0x10] sm:$0xff]   ;;  %v2110_v4 = vld [vmem:[#allocation6 + $0x18] sm:$0xff]   ;;  %v2111_v5 = vld [vmem:[#allocation6 + $0x20] sm:$0xff]   ;;  %s1823_s21 = smul.u32 3584, %s2343_s12  ;;  %s1508_s12 = scalar_lea.sflag [#allocation5], %s2523_s8 }
  0x5d   : > { %800 = vmatpush1.bf16.msra.mxu0 %v2107_v1  ;;  %2008 = vmatpush1.bf16.msra.mxu1 %v2107_v1  ;;  %v2125_v6 = vld [vmem:[%s2527_s26 + $0x4] ss:$8 sps:$4 sm:$0xff]   ;;  %v2113_v9 = vld [vmem:[#allocation6 + $0x30] sm:$0xff]   ;;  %v2114_v10 = vld [vmem:[#allocation6 + $0x38] sm:$0xff]   ;;  %s2626_s19 = scalar_lea.vmem [#allocation8], %s2026_s17  ;;  %s2360_s24 = smov [#allocation8]  }
  0x5e   : > { %801 = vmatprep.subr.bf16.mxu0 %v2359_v0  ;;  %1993 = vmatprep.subr.bf16.mxu1 %v2359_v0  ;;  %v2112_v7 = vld [vmem:[#allocation6 + $0x28] sm:$0xff]   ;;  %v2115_v11 = vld [vmem:[#allocation6 + $0x40] sm:$0xff]   ;;  %v2117_v13 = vld [vmem:[#allocation6 + $0x50] sm:$0xff]   ;;  %s1522_s30 = sshll.u32 %s2626_s19, 4  ;;  %s2659_s6 = scalar_lea.hbm %s2713_s2, %s1823_s21  ;;  %s2661_s30 = int_to_ptr.vmem [resolvable:$true] %s1522_s30 }
  0x5f   : > { %v2128_v8 = vld [vmem:[%s2527_s26 + $0xe4] ss:$8 sps:$4 sm:$0xff]   ;;  %831 = vmatprep.mubr.bf16.mxu0 %v2125_v6  ;;  %v2118_v14 = vld [vmem:[#allocation6 + $0x58] sm:$0xff]   ;;  %v2121_v17 = vld [vmem:[#allocation6 + $0x70] sm:$0xff]   ;;  %s2265_s27 = scalar_lea.vmem %s2661_s30, 3584  ;;  %s2269_s23 = sshll.u32 %s2360_s24, 4  ;;  %s2270_s23 = int_to_ptr.vmem [resolvable:$false] %s2269_s23 }
  0x60   : > { %943 = vmatprep.mubr.bf16.mxu1 %v2128_v8  ;;  %v2116_v12 = vld [vmem:[#allocation6 + $0x48] sm:$0xff]   ;;  %v2119_v15 = vld [vmem:[#allocation6 + $0x60] sm:$0xff]   ;;  %v2122_v18 = vld [vmem:[#allocation6 + $0x78] sm:$0xff]   ;;  %p2266_p4 = scmp.ne.s32.totalorder %s2661_s30, %s2265_s27  ;;  %s2271_s29 = scalar_lea.vmem %s2270_s23, 7168 }
  0x61   : > { %802 = vmatpush1.bf16.msra.mxu0 %v2108_v2  ;;  %2009 = vmatpush1.bf16.msra.mxu1 %v2108_v2  ;;  %v2120_v16 = vld [vmem:[#allocation6 + $0x68] sm:$0xff]   ;;  %v2129_v21 = vld [vmem:[%s2527_s26 + $0x14] ss:$8 sps:$4 sm:$0xff]   ;;  %v2133_v23 = vld [vmem:[%s2527_s26 + $0x10] ss:$8 sps:$4 sm:$0xff]   ;;  %p2272_p12 = scmp.lt.s32.totalorder %s2661_s30, %s2270_s23  ;;  %p2273_p13 = scmp.lt.s32.totalorder %s2271_s29, %s2265_s27 }
  0x62   : > { %803 = vmatprep.subr.bf16.mxu0 %v2359_v0  ;;  %1994 = vmatprep.subr.bf16.mxu1 %v2359_v0  ;;  %v2123_v19 = vld [vmem:[%s2527_s26] ss:$8 sps:$4 sm:$0xff]   ;;  %v2131_v22 = vld [vmem:[%s2527_s26 + $0xf4] ss:$8 sps:$4 sm:$0xff]   ;;  %v2134_v24 = vld [vmem:[%s2527_s26 + $0xf0] ss:$8 sps:$4 sm:$0xff]   ;;  %p2267_p6 = pnand %p2266_p4, %p2469_p11 }
  0x63   : > { %v2126_v20 = vld [vmem:[%s2527_s26 + $0xe0] ss:$8 sps:$4 sm:$0xff]   ;;  %v2135_v25 = vld [vmem:[%s2527_s26 + $0x24] ss:$8 sps:$4 sm:$0xff]   ;;  %v2141_v29 = vld [vmem:[%s2527_s26 + $0x34] ss:$8 sps:$4 sm:$0xff]   ;;  %p2274_p0 = por %p2273_p13, %p2272_p12 }
  0x64   : > { %v2137_v26 = vld [vmem:[%s2527_s26 + $0x104] ss:$8 sps:$4 sm:$0xff]   ;;  %v2139_v27 = vld [vmem:[%s2527_s26 + $0x20] ss:$8 sps:$4 sm:$0xff]   ;;  %v2143_v30 = vld [vmem:[%s2527_s26 + $0x114] ss:$8 sps:$4 sm:$0xff]   ;;  %p2268_p8 = pneg %p2267_p6 }
  0x65   : > { %804 = vmatpush1.bf16.msra.mxu0 %v2109_v3  ;;  %2010 = vmatpush1.bf16.msra.mxu1 %v2109_v3  ;;  %v2140_v28 = vld [vmem:[%s2527_s26 + $0x100] ss:$8 sps:$4 sm:$0xff]   ;;  %v2145_v31 = vld [vmem:[%s2527_s26 + $0x30] ss:$8 sps:$4 sm:$0xff]   ;;  %v2147_v33 = vld [vmem:[%s2527_s26 + $0x44] ss:$8 sps:$4 sm:$0xff]  }
  0x66   : > { %805 = vmatprep.subr.bf16.mxu0 %v2359_v0  ;;  %1995 = vmatprep.subr.bf16.mxu1 %v2359_v0  ;;  %v2146_v32 = vld [vmem:[%s2527_s26 + $0x110] ss:$8 sps:$4 sm:$0xff]   ;;  %v2149_v34 = vld [vmem:[%s2527_s26 + $0x124] ss:$8 sps:$4 sm:$0xff]   ;;  %v2151_v35 = vld [vmem:[%s2527_s26 + $0x40] ss:$8 sps:$4 sm:$0xff]   ;;  %p2275_p5 = pnand %p2274_p0, %p2268_p8 }
  0x67   : > { %v2152_v36 = vld [vmem:[%s2527_s26 + $0x120] ss:$8 sps:$4 sm:$0xff]   ;;  %v2153_v37 = vld [vmem:[%s2527_s26 + $0x54] ss:$8 sps:$4 sm:$0xff]   ;;  %v2157_v39 = vld [vmem:[%s2527_s26 + $0x50] ss:$8 sps:$4 sm:$0xff]  }
  0x68   : > { %v2155_v38 = vld [vmem:[%s2527_s26 + $0x134] ss:$8 sps:$4 sm:$0xff]   ;;  %v2158_v40 = vld [vmem:[%s2527_s26 + $0x130] ss:$8 sps:$4 sm:$0xff]   ;;  %v2159_v41 = vld [vmem:[%s2527_s26 + $0x64] ss:$8 sps:$4 sm:$0xff]  }
  0x69   : > { %806 = vmatpush1.bf16.msra.mxu0 %v2110_v4  ;;  %2011 = vmatpush1.bf16.msra.mxu1 %v2110_v4  ;;  %v2161_v42 = vld [vmem:[%s2527_s26 + $0x144] ss:$8 sps:$4 sm:$0xff]   ;;  %v2163_v43 = vld [vmem:[%s2527_s26 + $0x60] ss:$8 sps:$4 sm:$0xff]   ;;  %v2165_v45 = vld [vmem:[%s2527_s26 + $0x74] ss:$8 sps:$4 sm:$0xff]  }
  0x6a   : > { %807 = vmatprep.subr.bf16.mxu0 %v2359_v0  ;;  %1996 = vmatprep.subr.bf16.mxu1 %v2359_v0  ;;  %v2164_v44 = vld [vmem:[%s2527_s26 + $0x140] ss:$8 sps:$4 sm:$0xff]   ;;  %v2167_v46 = vld [vmem:[%s2527_s26 + $0x154] ss:$8 sps:$4 sm:$0xff]   ;;  %v2169_v47 = vld [vmem:[%s2527_s26 + $0x70] ss:$8 sps:$4 sm:$0xff]  }
  0x6b   : > { %v2170_v48 = vld [vmem:[%s2527_s26 + $0x150] ss:$8 sps:$4 sm:$0xff]   ;;  %v2171_v49 = vld [vmem:[%s2527_s26 + $0x84] ss:$8 sps:$4 sm:$0xff]   ;;  %v2175_v51 = vld [vmem:[%s2527_s26 + $0x80] ss:$8 sps:$4 sm:$0xff]  }
  0x6c   : > { %v2173_v50 = vld [vmem:[%s2527_s26 + $0x164] ss:$8 sps:$4 sm:$0xff]   ;;  %v2176_v52 = vld [vmem:[%s2527_s26 + $0x160] ss:$8 sps:$4 sm:$0xff]   ;;  %v2177_v53 = vld [vmem:[%s2527_s26 + $0x94] ss:$8 sps:$4 sm:$0xff]  }
  0x6d   : > { %808 = vmatpush1.bf16.msra.mxu0 %v2111_v5  ;;  %2012 = vmatpush1.bf16.msra.mxu1 %v2111_v5  ;;  %v2179_v54 = vld [vmem:[%s2527_s26 + $0x174] ss:$8 sps:$4 sm:$0xff]   ;;  %v2181_v55 = vld [vmem:[%s2527_s26 + $0x90] ss:$8 sps:$4 sm:$0xff]   ;;  %v2183_v57 = vld [vmem:[%s2527_s26 + $0xa4] ss:$8 sps:$4 sm:$0xff]  }
  0x6e   : > { %809 = vmatprep.subr.bf16.mxu0 %v2359_v0  ;;  %1997 = vmatprep.subr.bf16.mxu1 %v2359_v0  ;;  %v2182_v56 = vld [vmem:[%s2527_s26 + $0x170] ss:$8 sps:$4 sm:$0xff]   ;;  %v2185_v58 = vld [vmem:[%s2527_s26 + $0x184] ss:$8 sps:$4 sm:$0xff]   ;;  %v2187_v59 = vld [vmem:[%s2527_s26 + $0xa0] ss:$8 sps:$4 sm:$0xff]  }
  0x6f   : > { %v2188_v60 = vld [vmem:[%s2527_s26 + $0x180] ss:$8 sps:$4 sm:$0xff]   ;;  %v2189_v61 = vld [vmem:[%s2527_s26 + $0xb4] ss:$8 sps:$4 sm:$0xff]   ;;  %v2193_v63 = vld [vmem:[%s2527_s26 + $0xb0] ss:$8 sps:$4 sm:$0xff]  }
  0x70   : > { %v2191_v62 = vld [vmem:[%s2527_s26 + $0x194] ss:$8 sps:$4 sm:$0xff]   ;;  %v2195_v1 = vld [vmem:[%s2527_s26 + $0xc4] ss:$8 sps:$4 sm:$0xff]   ;;  %v2199_v3 = vld [vmem:[%s2527_s26 + $0xc0] ss:$8 sps:$4 sm:$0xff]  }
  0x71   : > { %810 = vmatpush1.bf16.msra.mxu0 %v2112_v7  ;;  %2013 = vmatpush1.bf16.msra.mxu1 %v2112_v7  ;;  %v2197_v2 = vld [vmem:[%s2527_s26 + $0x1a4] ss:$8 sps:$4 sm:$0xff]   ;;  %v2200_v4 = vld [vmem:[%s2527_s26 + $0x1a0] ss:$8 sps:$4 sm:$0xff]   ;;  %v2201_v5 = vld [vmem:[%s2527_s26 + $0xd4] ss:$8 sps:$4 sm:$0xff]  }
  0x72   : > { %811 = vmatprep.subr.bf16.mxu0 %v2359_v0  ;;  %1998 = vmatprep.subr.bf16.mxu1 %v2359_v0  ;;  %v2203_v6 = vld [vmem:[%s2527_s26 + $0x1b4] ss:$8 sps:$4 sm:$0xff]   ;;  %v2205_v7 = vld [vmem:[%s2527_s26 + $0xd0] ss:$8 sps:$4 sm:$0xff]  }
  0x73   : > { %v2206_v8 = vld [vmem:[%s2527_s26 + $0x1b0] ss:$8 sps:$4 sm:$0xff]  }
  0x75   : > { %812 = vmatpush1.bf16.msra.mxu0 %v2113_v9  ;;  %2014 = vmatpush1.bf16.msra.mxu1 %v2113_v9 }
  0x76   : > { %813 = vmatprep.subr.bf16.mxu0 %v2359_v0  ;;  %1999 = vmatprep.subr.bf16.mxu1 %v2359_v0 }
  0x79   : > { %814 = vmatpush1.bf16.msra.mxu0 %v2114_v10  ;;  %2015 = vmatpush1.bf16.msra.mxu1 %v2114_v10 }
  0x7a   : > { %815 = vmatprep.subr.bf16.mxu0 %v2359_v0  ;;  %2000 = vmatprep.subr.bf16.mxu1 %v2359_v0 }
  0x7d   : > { %816 = vmatpush1.bf16.msra.mxu0 %v2115_v11  ;;  %2016 = vmatpush1.bf16.msra.mxu1 %v2115_v11 }
  0x7e   : > { %817 = vmatprep.subr.bf16.mxu0 %v2359_v0  ;;  %2001 = vmatprep.subr.bf16.mxu1 %v2359_v0 }
  0x81   : > { %818 = vmatpush1.bf16.msra.mxu0 %v2116_v12  ;;  %2017 = vmatpush1.bf16.msra.mxu1 %v2116_v12 }
  0x82   : > { %819 = vmatprep.subr.bf16.mxu0 %v2359_v0  ;;  %2002 = vmatprep.subr.bf16.mxu1 %v2359_v0 }
  0x85   : > { %820 = vmatpush1.bf16.msra.mxu0 %v2117_v13  ;;  %2018 = vmatpush1.bf16.msra.mxu1 %v2117_v13 }
  0x86   : > { %821 = vmatprep.subr.bf16.mxu0 %v2359_v0  ;;  %2003 = vmatprep.subr.bf16.mxu1 %v2359_v0 }
  0x89   : > { %822 = vmatpush1.bf16.msra.mxu0 %v2118_v14  ;;  %2019 = vmatpush1.bf16.msra.mxu1 %v2118_v14 }
  0x8a   : > { %823 = vmatprep.subr.bf16.mxu0 %v2359_v0  ;;  %2004 = vmatprep.subr.bf16.mxu1 %v2359_v0 }
  0x8d   : > { %824 = vmatpush1.bf16.msra.mxu0 %v2119_v15  ;;  %2020 = vmatpush1.bf16.msra.mxu1 %v2119_v15 }
  0x8e   : > { %825 = vmatprep.subr.bf16.mxu0 %v2359_v0  ;;  %2005 = vmatprep.subr.bf16.mxu1 %v2359_v0 }
  0x91   : > { %826 = vmatpush1.bf16.msra.mxu0 %v2120_v16  ;;  %2021 = vmatpush1.bf16.msra.mxu1 %v2120_v16 }
  0x92   : > { %827 = vmatprep.subr.bf16.mxu0 %v2359_v0  ;;  %2006 = vmatprep.subr.bf16.mxu1 %v2359_v0 }
  0x95   : > { %828 = vmatpush1.bf16.msra.mxu0 %v2121_v17  ;;  %2022 = vmatpush1.bf16.msra.mxu1 %v2121_v17 }
  0x96   : > { %829 = vmatprep.subr.bf16.mxu0 %v2359_v0  ;;  %2007 = vmatprep.subr.bf16.mxu1 %v2359_v0  ;;  %v2194_v0 = vld [vmem:[%s2527_s26 + $0x190] ss:$8 sps:$4 sm:$0xff]  }
  0x99   : > { %830 = vmatpush1.bf16.msra.mxu0 %v2122_v18  ;;  %2023 = vmatpush1.bf16.msra.mxu1 %v2122_v18 }
  0x9c   : > { %832 = vmatmul.mubr.bf16.vlgmr.msra.gmra.mrb[0].mxu0 %v2123_v19  ;;  %944 = vmatmul.mubr.bf16.vlgmr.msra.gmra.mrb[0].mxu1 %v2126_v20 }
  0x9d   : > { %839 = vmatprep.mubr.bf16.mxu0 %v2129_v21  ;;  %951 = vmatprep.mubr.bf16.mxu1 %v2131_v22 }
  0xa4   : > { %840 = vmatmul.mubr.bf16.gmra.mrb[4].mxu0 %v2133_v23  ;;  %952 = vmatmul.mubr.bf16.gmra.mrb[4].mxu1 %v2134_v24 }
  0xa5   : > { %847 = vmatprep.mubr.bf16.mxu0 %v2135_v25  ;;  %959 = vmatprep.mubr.bf16.mxu1 %v2137_v26 }
  0xac   : > { %848 = vmatmul.mubr.bf16.gmra.mrb[8].mxu0 %v2139_v27  ;;  %960 = vmatmul.mubr.bf16.gmra.mrb[8].mxu1 %v2140_v28 }
  0xad   : > { %855 = vmatprep.mubr.bf16.mxu0 %v2141_v29  ;;  %967 = vmatprep.mubr.bf16.mxu1 %v2143_v30 }
  0xb4   : > { %856 = vmatmul.mubr.bf16.gmra.mrb[12].mxu0 %v2145_v31  ;;  %968 = vmatmul.mubr.bf16.gmra.mrb[12].mxu1 %v2146_v32 }
  0xb5   : > { %863 = vmatprep.mubr.bf16.mxu0 %v2147_v33  ;;  %975 = vmatprep.mubr.bf16.mxu1 %v2149_v34 }
  0xbc   : > { %864 = vmatmul.mubr.bf16.gmra.mrb[16].mxu0 %v2151_v35  ;;  %976 = vmatmul.mubr.bf16.gmra.mrb[16].mxu1 %v2152_v36 }
  0xbd   : > { %871 = vmatprep.mubr.bf16.mxu0 %v2153_v37  ;;  %983 = vmatprep.mubr.bf16.mxu1 %v2155_v38 }
  0xc4   : > { %872 = vmatmul.mubr.bf16.gmra.mrb[20].mxu0 %v2157_v39  ;;  %984 = vmatmul.mubr.bf16.gmra.mrb[20].mxu1 %v2158_v40 }
  0xc5   : > { %879 = vmatprep.mubr.bf16.mxu0 %v2159_v41  ;;  %991 = vmatprep.mubr.bf16.mxu1 %v2161_v42 }
  0xcc   : > { %880 = vmatmul.mubr.bf16.gmra.mrb[24].mxu0 %v2163_v43  ;;  %992 = vmatmul.mubr.bf16.gmra.mrb[24].mxu1 %v2164_v44 }
  0xcd   : > { %887 = vmatprep.mubr.bf16.mxu0 %v2165_v45  ;;  %999 = vmatprep.mubr.bf16.mxu1 %v2167_v46 }
  0xd4   : > { %888 = vmatmul.mubr.bf16.gmra.mrb[28].mxu0 %v2169_v47  ;;  %1000 = vmatmul.mubr.bf16.gmra.mrb[28].mxu1 %v2170_v48 }
  0xd5   : > { %895 = vmatprep.mubr.bf16.mxu0 %v2171_v49  ;;  %1007 = vmatprep.mubr.bf16.mxu1 %v2173_v50 }
  0xdc   : > { %896 = vmatmul.mubr.bf16.gmra.mrb[32].mxu0 %v2175_v51  ;;  %1008 = vmatmul.mubr.bf16.gmra.mrb[32].mxu1 %v2176_v52 }
  0xdd   : > { %903 = vmatprep.mubr.bf16.mxu0 %v2177_v53  ;;  %1015 = vmatprep.mubr.bf16.mxu1 %v2179_v54 }
  0xe4   : > { %904 = vmatmul.mubr.bf16.gmra.mrb[36].mxu0 %v2181_v55  ;;  %1016 = vmatmul.mubr.bf16.gmra.mrb[36].mxu1 %v2182_v56 }
  0xe5   : > { %911 = vmatprep.mubr.bf16.mxu0 %v2183_v57  ;;  %1023 = vmatprep.mubr.bf16.mxu1 %v2185_v58 }
  0xec   : > { %912 = vmatmul.mubr.bf16.gmra.mrb[40].mxu0 %v2187_v59  ;;  %1024 = vmatmul.mubr.bf16.gmra.mrb[40].mxu1 %v2188_v60 }
  0xed   : > { %919 = vmatprep.mubr.bf16.mxu0 %v2189_v61  ;;  %1031 = vmatprep.mubr.bf16.mxu1 %v2191_v62 }
  0xf4   : > { %920 = vmatmul.mubr.bf16.gmra.mrb[44].mxu0 %v2193_v63  ;;  %1032 = vmatmul.mubr.bf16.gmra.mrb[44].mxu1 %v2194_v0 }
  0xf5   : > { %927 = vmatprep.mubr.bf16.mxu0 %v2195_v1  ;;  %1039 = vmatprep.mubr.bf16.mxu1 %v2197_v2 }
  0xfc   : > { %928 = vmatmul.mubr.bf16.gmra.mrb[48].mxu0 %v2199_v3  ;;  %1040 = vmatmul.mubr.bf16.gmra.mrb[48].mxu1 %v2200_v4 }
  0xfd   : > { %935 = vmatprep.mubr.bf16.mxu0 %v2201_v5  ;;  %1047 = vmatprep.mubr.bf16.mxu1 %v2203_v6 }
 0x104   : > { %936 = vmatmul.mubr.bf16.gmra.mrb[52].mxu0 %v2205_v7  ;;  %1048 = vmatmul.mubr.bf16.gmra.mrb[52].mxu1 %v2206_v8 }
 0x16f   : > { %v833_v9 = vpop.f32.mrb[0].mxu0  ;;  %v945_v10 = vpop.f32.mrb[0].mxu1 }
 0x170   : > { %v835_v11 = vpop.f32.mrb[1].mxu0  ;;  %v947_v12 = vpop.f32.mrb[1].mxu1 }
 0x171   : > { %v836_v13 = vpop.f32.mrb[2].mxu0  ;;  %v948_v14 = vpop.f32.mrb[2].mxu1 }
 0x172   : > { %v1827_v15 = vpack.c.bf16 %v836_v13, %v833_v9  ;;  %v1897_v16 = vpack.c.bf16 %v948_v14, %v945_v10  ;;  %v838_v17 = vpop.f32.mrb[3].mxu0  ;;  %v950_v18 = vpop.f32.mrb[3].mxu1 }
 0x174   : > { %1828 = vst [vmem:[%s2626_s19] sm:$0xff] %v1827_v15   ;;  %1978 = vst [vmem:[%s2626_s19 + $0x70] sm:$0xff] %v1897_v16  }
 0x177   : > { %v841_v19 = vpop.f32.mrb[4].mxu0  ;;  %v953_v20 = vpop.f32.mrb[4].mxu1 }
 0x178   : > { %v843_v21 = vpop.f32.mrb[5].mxu0  ;;  %v955_v22 = vpop.f32.mrb[5].mxu1 }
 0x179   : > { %v844_v23 = vpop.f32.mrb[6].mxu0  ;;  %v956_v24 = vpop.f32.mrb[6].mxu1 }
 0x17a   : > { %v1832_v25 = vpack.c.bf16 %v844_v23, %v841_v19  ;;  %v1902_v26 = vpack.c.bf16 %v956_v24, %v953_v20  ;;  %v846_v27 = vpop.f32.mrb[7].mxu0  ;;  %v958_v28 = vpop.f32.mrb[7].mxu1 }
 0x17c   : > { %1965 = vst [vmem:[%s2626_s19 + $0x8] sm:$0xff] %v1832_v25   ;;  %1979 = vst [vmem:[%s2626_s19 + $0x78] sm:$0xff] %v1902_v26  }
 0x17f   : > { %v849_v29 = vpop.f32.mrb[8].mxu0  ;;  %v961_v30 = vpop.f32.mrb[8].mxu1 }
 0x180   : > { %v851_v31 = vpop.f32.mrb[9].mxu0  ;;  %v963_v32 = vpop.f32.mrb[9].mxu1 }
 0x181   : > { %v852_v33 = vpop.f32.mrb[10].mxu0  ;;  %v964_v34 = vpop.f32.mrb[10].mxu1 }
 0x182   : > { %v1837_v35 = vpack.c.bf16 %v852_v33, %v849_v29  ;;  %v1907_v36 = vpack.c.bf16 %v964_v34, %v961_v30  ;;  %v854_v37 = vpop.f32.mrb[11].mxu0  ;;  %v966_v38 = vpop.f32.mrb[11].mxu1 }
 0x184   : > { %1966 = vst [vmem:[%s2626_s19 + $0x10] sm:$0xff] %v1837_v35   ;;  %1980 = vst [vmem:[%s2626_s19 + $0x80] sm:$0xff] %v1907_v36  }
 0x187   : > { %v857_v39 = vpop.f32.mrb[12].mxu0  ;;  %v969_v40 = vpop.f32.mrb[12].mxu1 }
 0x188   : > { %v859_v41 = vpop.f32.mrb[13].mxu0  ;;  %v971_v42 = vpop.f32.mrb[13].mxu1 }
 0x189   : > { %v860_v43 = vpop.f32.mrb[14].mxu0  ;;  %v972_v44 = vpop.f32.mrb[14].mxu1 }
 0x18a   : > { %v1842_v45 = vpack.c.bf16 %v860_v43, %v857_v39  ;;  %v1912_v46 = vpack.c.bf16 %v972_v44, %v969_v40  ;;  %v862_v47 = vpop.f32.mrb[15].mxu0  ;;  %v974_v48 = vpop.f32.mrb[15].mxu1 }
 0x18c   : > { %1967 = vst [vmem:[%s2626_s19 + $0x18] sm:$0xff] %v1842_v45   ;;  %1981 = vst [vmem:[%s2626_s19 + $0x88] sm:$0xff] %v1912_v46  }
 0x18f   : > { %v865_v49 = vpop.f32.mrb[16].mxu0  ;;  %v977_v50 = vpop.f32.mrb[16].mxu1 }
 0x190   : > { %v867_v51 = vpop.f32.mrb[17].mxu0  ;;  %v979_v52 = vpop.f32.mrb[17].mxu1 }
 0x191   : > { %v868_v53 = vpop.f32.mrb[18].mxu0  ;;  %v980_v54 = vpop.f32.mrb[18].mxu1 }
 0x192   : > { %v1847_v55 = vpack.c.bf16 %v868_v53, %v865_v49  ;;  %v1917_v56 = vpack.c.bf16 %v980_v54, %v977_v50  ;;  %v870_v57 = vpop.f32.mrb[19].mxu0  ;;  %v982_v58 = vpop.f32.mrb[19].mxu1 }
 0x194   : > { %1968 = vst [vmem:[%s2626_s19 + $0x20] sm:$0xff] %v1847_v55   ;;  %1982 = vst [vmem:[%s2626_s19 + $0x90] sm:$0xff] %v1917_v56  }
 0x197   : > { %v873_v59 = vpop.f32.mrb[20].mxu0  ;;  %v985_v60 = vpop.f32.mrb[20].mxu1 }
 0x198   : > { %v875_v61 = vpop.f32.mrb[21].mxu0  ;;  %v987_v62 = vpop.f32.mrb[21].mxu1 }
 0x199   : > { %v876_v63 = vpop.f32.mrb[22].mxu0  ;;  %v988_v0 = vpop.f32.mrb[22].mxu1 }
 0x19a   : > { %v1852_v1 = vpack.c.bf16 %v876_v63, %v873_v59  ;;  %v1922_v2 = vpack.c.bf16 %v988_v0, %v985_v60  ;;  %v878_v3 = vpop.f32.mrb[23].mxu0  ;;  %v990_v4 = vpop.f32.mrb[23].mxu1 }
 0x19c   : > { %1969 = vst [vmem:[%s2626_s19 + $0x28] sm:$0xff] %v1852_v1   ;;  %1983 = vst [vmem:[%s2626_s19 + $0x98] sm:$0xff] %v1922_v2  }
 0x19f   : > { %v881_v5 = vpop.f32.mrb[24].mxu0  ;;  %v993_v6 = vpop.f32.mrb[24].mxu1 }
 0x1a0   : > { %v883_v7 = vpop.f32.mrb[25].mxu0  ;;  %v995_v8 = vpop.f32.mrb[25].mxu1 }
 0x1a1   : > { %v884_v9 = vpop.f32.mrb[26].mxu0  ;;  %v996_v10 = vpop.f32.mrb[26].mxu1 }
 0x1a2   : > { %v1857_v11 = vpack.c.bf16 %v884_v9, %v881_v5  ;;  %v1927_v12 = vpack.c.bf16 %v996_v10, %v993_v6  ;;  %v886_v13 = vpop.f32.mrb[27].mxu0  ;;  %v998_v14 = vpop.f32.mrb[27].mxu1 }
 0x1a4   : > { %1970 = vst [vmem:[%s2626_s19 + $0x30] sm:$0xff] %v1857_v11   ;;  %1984 = vst [vmem:[%s2626_s19 + $0xa0] sm:$0xff] %v1927_v12  }
 0x1a7   : > { %v889_v15 = vpop.f32.mrb[28].mxu0  ;;  %v1001_v16 = vpop.f32.mrb[28].mxu1 }
 0x1a8   : > { %v891_v17 = vpop.f32.mrb[29].mxu0  ;;  %v1003_v18 = vpop.f32.mrb[29].mxu1 }
 0x1a9   : > { %v892_v19 = vpop.f32.mrb[30].mxu0  ;;  %v1004_v20 = vpop.f32.mrb[30].mxu1 }
 0x1aa   : > { %v1862_v21 = vpack.c.bf16 %v892_v19, %v889_v15  ;;  %v1932_v22 = vpack.c.bf16 %v1004_v20, %v1001_v16  ;;  %v894_v23 = vpop.f32.mrb[31].mxu0  ;;  %v1006_v24 = vpop.f32.mrb[31].mxu1 }
 0x1ac   : > { %1971 = vst [vmem:[%s2626_s19 + $0x38] sm:$0xff] %v1862_v21   ;;  %1985 = vst [vmem:[%s2626_s19 + $0xa8] sm:$0xff] %v1932_v22  }
 0x1af   : > { %v897_v25 = vpop.f32.mrb[32].mxu0  ;;  %v1009_v26 = vpop.f32.mrb[32].mxu1 }
 0x1b0   : > { %v899_v27 = vpop.f32.mrb[33].mxu0  ;;  %v1011_v28 = vpop.f32.mrb[33].mxu1 }
 0x1b1   : > { %v900_v29 = vpop.f32.mrb[34].mxu0  ;;  %v1012_v30 = vpop.f32.mrb[34].mxu1 }
 0x1b2   : > { %v1867_v31 = vpack.c.bf16 %v900_v29, %v897_v25  ;;  %v1937_v32 = vpack.c.bf16 %v1012_v30, %v1009_v26  ;;  %v902_v33 = vpop.f32.mrb[35].mxu0  ;;  %v1014_v34 = vpop.f32.mrb[35].mxu1 }
 0x1b4   : > { %1972 = vst [vmem:[%s2626_s19 + $0x40] sm:$0xff] %v1867_v31   ;;  %1986 = vst [vmem:[%s2626_s19 + $0xb0] sm:$0xff] %v1937_v32  }
 0x1b7   : > { %v905_v35 = vpop.f32.mrb[36].mxu0  ;;  %v1017_v36 = vpop.f32.mrb[36].mxu1 }
 0x1b8   : > { %v907_v37 = vpop.f32.mrb[37].mxu0  ;;  %v1019_v38 = vpop.f32.mrb[37].mxu1 }
 0x1b9   : > { %v908_v39 = vpop.f32.mrb[38].mxu0  ;;  %v1020_v40 = vpop.f32.mrb[38].mxu1 }
 0x1ba   : > { %v1872_v41 = vpack.c.bf16 %v908_v39, %v905_v35  ;;  %v1942_v42 = vpack.c.bf16 %v1020_v40, %v1017_v36  ;;  %v910_v43 = vpop.f32.mrb[39].mxu0  ;;  %v1022_v44 = vpop.f32.mrb[39].mxu1 }
 0x1bc   : > { %1973 = vst [vmem:[%s2626_s19 + $0x48] sm:$0xff] %v1872_v41   ;;  %1987 = vst [vmem:[%s2626_s19 + $0xb8] sm:$0xff] %v1942_v42  }
 0x1bf   : > { %v913_v45 = vpop.f32.mrb[40].mxu0  ;;  %v1025_v46 = vpop.f32.mrb[40].mxu1 }
 0x1c0   : > { %v915_v47 = vpop.f32.mrb[41].mxu0  ;;  %v1027_v48 = vpop.f32.mrb[41].mxu1 }
 0x1c1   : > { %v916_v49 = vpop.f32.mrb[42].mxu0  ;;  %v1028_v50 = vpop.f32.mrb[42].mxu1 }
 0x1c2   : > { %v1877_v51 = vpack.c.bf16 %v916_v49, %v913_v45  ;;  %v1947_v52 = vpack.c.bf16 %v1028_v50, %v1025_v46  ;;  %v918_v53 = vpop.f32.mrb[43].mxu0  ;;  %v1030_v54 = vpop.f32.mrb[43].mxu1 }
 0x1c4   : > { %1974 = vst [vmem:[%s2626_s19 + $0x50] sm:$0xff] %v1877_v51   ;;  %1988 = vst [vmem:[%s2626_s19 + $0xc0] sm:$0xff] %v1947_v52  }
 0x1c7   : > { %v921_v55 = vpop.f32.mrb[44].mxu0  ;;  %v1033_v56 = vpop.f32.mrb[44].mxu1 }
 0x1c8   : > { %v923_v57 = vpop.f32.mrb[45].mxu0  ;;  %v1035_v58 = vpop.f32.mrb[45].mxu1 }
 0x1c9   : > { %v924_v59 = vpop.f32.mrb[46].mxu0  ;;  %v1036_v60 = vpop.f32.mrb[46].mxu1 }
 0x1ca   : > { %v1882_v61 = vpack.c.bf16 %v924_v59, %v921_v55  ;;  %v1952_v62 = vpack.c.bf16 %v1036_v60, %v1033_v56  ;;  %v926_v63 = vpop.f32.mrb[47].mxu0  ;;  %v1038_v0 = vpop.f32.mrb[47].mxu1 }
 0x1cc   : > { %1975 = vst [vmem:[%s2626_s19 + $0x58] sm:$0xff] %v1882_v61   ;;  %1989 = vst [vmem:[%s2626_s19 + $0xc8] sm:$0xff] %v1952_v62  }
 0x1cf   : > { %v929_v1 = vpop.f32.mrb[48].mxu0  ;;  %v1041_v2 = vpop.f32.mrb[48].mxu1 }
 0x1d0   : > { %v931_v3 = vpop.f32.mrb[49].mxu0  ;;  %v1043_v4 = vpop.f32.mrb[49].mxu1 }
 0x1d1   : > { %v932_v5 = vpop.f32.mrb[50].mxu0  ;;  %v1044_v6 = vpop.f32.mrb[50].mxu1 }
 0x1d2   : > { %v1887_v7 = vpack.c.bf16 %v932_v5, %v929_v1  ;;  %v1957_v8 = vpack.c.bf16 %v1044_v6, %v1041_v2  ;;  %v934_v9 = vpop.f32.mrb[51].mxu0  ;;  %v1046_v10 = vpop.f32.mrb[51].mxu1 }
 0x1d4   : > { %1976 = vst [vmem:[%s2626_s19 + $0x60] sm:$0xff] %v1887_v7   ;;  %1990 = vst [vmem:[%s2626_s19 + $0xd0] sm:$0xff] %v1957_v8  }
 0x1d7   : > { %v937_v11 = vpop.f32.mrb[52].mxu0  ;;  %v1049_v12 = vpop.f32.mrb[52].mxu1 }
 0x1d8   : > { %v939_v13 = vpop.f32.mrb[53].mxu0  ;;  %v1051_v14 = vpop.f32.mrb[53].mxu1 }
 0x1d9   : > { %v940_v15 = vpop.f32.mrb[54].mxu0  ;;  %v1052_v16 = vpop.f32.mrb[54].mxu1 }
 0x1da   : > { %v1892_v17 = vpack.c.bf16 %v940_v15, %v937_v11  ;;  %v1962_v18 = vpack.c.bf16 %v1052_v16, %v1049_v12  ;;  %v942_v19 = vpop.f32.mrb[55].mxu0  ;;  %v1054_v20 = vpop.f32.mrb[55].mxu1 }
 0x1dc   : > { %1977 = vst [vmem:[%s2626_s19 + $0x68] sm:$0xff] %v1892_v17   ;;  %1991 = vst [vmem:[%s2626_s19 + $0xd8] sm:$0xff] %v1962_v18  }
 0x1dd   : > { %2278 = shalt.err (!%p2275_p5)
}
 0x1de   : > { %s2279_s4 = scalar_lea.hbm %s2659_s6, 3584  ;;  %s2283_s15 = scalar_lea.hbm %s2713_s2, 100352 }
 0x1df   : > { %p2280_p9 = scmp.ne.s32.totalorder %s2659_s6, %s2279_s4  ;;  %p2284_p3 = scmp.lt.u32.totalorder %s2659_s6, %s2713_s2 }
 0x1e0   : > { %p2285_p7 = scmp.lt.u32.totalorder %s2283_s15, %s2279_s4  ;;  %p2287_p4 = scmp.lt.u32.totalorder %s2279_s4, %s2659_s6 }
 0x1e1   : > { %p2281_p1 = pnand %p2280_p9, %p2469_p11 }
 0x1e2   : > { %p2286_p10 = por %p2285_p7, %p2284_p3 }
 0x1e3   : > { %p2282_p2 = pneg %p2281_p1 }
 0x1e4   : > { %p2288_p6 = por %p2287_p4, %p2286_p10 }
 0x1e6   : > { %p2289_p8 = pnand %p2288_p6, %p2282_p2 }
 0x1e8   : > { %2292 = shalt.err (!%p2289_p8)
}
 0x1e9   : > { %s2361_s17 = smov 64   ;;  %s2362_s19 = smov 4  }
 0x1ea   : > { %2033 = dma.vmem_to_hbm [thread:$0]  (%p2469_p11), %s2661_s30, 3584, %s2659_s6, %s1508_s12, %s2361_s17, %s2361_s17, %s2362_s19  }
 0x1eb PF: > { %p2050_p12 = scmp.ge.s32.totalorder %s2351_s14, 2  ;;  %s1537_s21 = sand.u32 1, %s2331_s9  }
 0x1ec   : > { %p2730_p13 = scmp.ne.s32.totalorder %s2721_s20, 0  ;;  %s1538_s3 = scalar_lea.sflag [#allocation5], %s1537_s21 }
 0x1ee   : > { %p2044_p0 = pnand %p2050_p12, %p2730_p13 }
 0x1f0   : > { %2326 = dma.done.wait (!%p2044_p0), %s1538_s3, 3584  }
 0x1f1   : > { %2328 = vsyncadd (!%p2044_p0), %s1538_s3, 4294963712  ;;  %s19_s14 = sadd.s32 1, %s2351_s14   ;;  %s2731_s9 = smov %s2335_s10 }
 0x1f2   : > { %p16_p5 = scmp.ge.s32.totalorder %s19_s14, 30   ;;  %s2732_s10 = smov %s2339_s11 }
 0x1f3   : > { %s2733_s11 = smov %s2478_s28  ;;  %s2734_s12 = smov %s2347_s13 }
 0x1f4   : > { %s2735_s13 = smov %s2737_s25  ;;  %18 = sbr.rel (!%p16_p5) target bundleno = 7 (0x7), region = 86 }
 0x1fb   :  { %1543 = vsyncpa [#allocation4], 1 }
 0x1fc   :  { %1545 = vsyncpa [#allocation4 + $0x1], 1 }
 0x1fd   :  { %1546 = vsyncpa [#allocation7], 1 }
 0x1fe   :  { %1547 = vsyncpa [#allocation5], 1 }
 0x1ff   :  { %1549 = vsyncpa [#allocation5 + $0x1], 1 }

</bundles_post_ra>
